<compile_context>
chip_gen: v6e
topology: v6e:2x2x1
jax: 0.10.0
libtpu: 0.0.40
codegen_flags: <defaults>
</compile_context>

<pallas_src>
import functools

import jax
import jax.numpy as jnp
from jax.experimental import pallas as pl
from jax.experimental.pallas import tpu as pltpu


def _round_up(x: int, m: int) -> int:
    return ((x + m - 1) // m) * m


def _pick_tile(dim: int, align: int, max_tile: int) -> int:
    """Largest tile t = align * 2^k, t <= max_tile, that divides round_up(dim, align)."""
    full = _round_up(dim, align)
    best = align
    t = align
    while t <= min(max_tile, full):
        if full % t == 0:
            best = t
        t *= 2
    return best


def _kakuritsu_linear_kernel(x_ref, wT_ref, o_ref):
    # Output block index is invariant in k -> the f32 output tile stays
    # resident in VMEM across the whole IN reduction.  Zero it on the first
    # k-step and accumulate the MXU partial products directly into it.
    @pl.when(pl.program_id(2) == 0)
    def _():
        o_ref[...] = jnp.zeros_like(o_ref)

    # Canonical (tm, tk) @ (tk, tn) matmul, bf16 operands, f32 accumulation.
    o_ref[...] += jnp.dot(
        x_ref[...], wT_ref[...], preferred_element_type=jnp.float32
    )


@functools.partial(
    jax.jit,
    static_argnames=("out_features", "tn", "tk", "compute_dtype", "tm_max"),
)
def kakuritsu_linear(x, wT_padded, out_features, *, tn, tk,
                     compute_dtype=jnp.bfloat16, tm_max=512):
    """y = x @ gated_weight.T where `wT_padded` is the pre-gated, pre-transposed,
    pre-cast, pre-padded (INp, OUTp) weight."""
    B, IN = x.shape
    INp, OUTp = wT_padded.shape
    assert IN <= INp and OUTp % tn == 0 and INp % tk == 0

    # M tile: multiple of 16 for bf16 sublane packing (8 would do for f32);
    # grow with B up to tm_max so the weight stream is re-read fewer times.
    sub = 16 if compute_dtype == jnp.bfloat16 else 8
    tm = min(tm_max, _round_up(B, sub))
    Bp = _round_up(B, tm)

    # Only the activation is padded/cast per call (padded rows/cols are zero
    # and contribute nothing to the contraction).
    x_p = jnp.pad(x.astype(compute_dtype), ((0, Bp - B), (0, INp - IN)))

    grid = (Bp // tm, OUTp // tn, INp // tk)

    y_p = pl.pallas_call(
        _kakuritsu_linear_kernel,
        out_shape=jax.ShapeDtypeStruct((Bp, OUTp), jnp.float32),
        grid_spec=pltpu.PrefetchScalarGridSpec(
            num_scalar_prefetch=0,
            grid=grid,
            in_specs=[
                pl.BlockSpec((tm, tk), lambda i, j, k: (i, k)),   # x
                pl.BlockSpec((tk, tn), lambda i, j, k: (k, j)),   # gated W^T
            ],
            out_specs=pl.BlockSpec((tm, tn), lambda i, j, k: (i, j)),
        ),
        compiler_params=pltpu.CompilerParams(
            # B / OUT tiles are independent -> megacore-shardable on v7x;
            # IN is the reduction axis (last, "arbitrary").
            dimension_semantics=("parallel", "parallel", "arbitrary"),
            # Tiles above are <~3 MiB double-buffered; 32 MiB is ample and
            # safe on every generation (v7x scoped default, v5e needs it).
            vmem_limit_bytes=32 * 1024 * 1024,
        ),
    )(x_p, wT_padded)

    return y_p[:B, :out_features].astype(x.dtype)


class MyKakuritsu:
    """JAX/Pallas equivalent of the PyTorch `myKakuritsu` module (forward)."""

    def __init__(self, input_features, output_features, key, *,
                 compute_dtype=jnp.bfloat16):
        self.input_features = input_features
        self.output_features = output_features
        self.compute_dtype = compute_dtype

        # weight.data.uniform_(-0.1, 0.1), deterministic via PRNG key
        self.weight = jax.random.uniform(
            key, (output_features, input_features),
            minval=-0.1, maxval=0.1, dtype=jnp.float32)
        # Kakuritsu = ones(output_features, input_features) * 0.8
        self.kakuritsu = jnp.ones(
            (output_features, input_features), dtype=jnp.float32) * 0.8

        # --- one-time weight-side preparation (static parameters) ---------
        # tn / tk: largest pow2-multiple-of-128 tile that divides the
        # 128-aligned OUT / IN (no extra tail padding on awkward shapes).
        # tn capped at 256 so large OUT yields >=2 parallel tiles (2 TCs on v7x).
        self.tn = _pick_tile(output_features, 128, 256)
        self.tk = _pick_tile(input_features, 128, 512)
        OUTp = _round_up(output_features, self.tn)
        INp = _round_up(input_features, self.tk)

        # Pre-gate (fold Kakuritsu into the weight), pre-transpose to
        # (IN, OUT), pre-cast to the MXU compute dtype, pre-pad.  All of this
        # happens once, not on the per-call hot path.
        gated_wT = (self.weight * self.kakuritsu).T.astype(compute_dtype)
        self._wT_padded = jnp.pad(
            gated_wT,
            ((0, INp - input_features), (0, OUTp - output_features)))

    def __call__(self, x):
        return kakuritsu_linear(
            x, self._wT_padded, self.output_features,
            tn=self.tn, tk=self.tk, compute_dtype=self.compute_dtype)


if __name__ == "__main__":
    key = jax.random.PRNGKey(0)
    k_w, k_x = jax.random.split(key)

    batch = 8
    input_features = 32
    output_features = 16

    module = MyKakuritsu(input_features, output_features, k_w)
    x = jax.random.normal(k_x, (batch, input_features), dtype=jnp.float32)

    y = module(x)
    y = jax.block_until_ready(y)

    # Sanity checks against pure-JAX references.
    gated = module.weight * module.kakuritsu
    # (a) tight check against a reference using the same bf16 operand rounding
    y_ref_bf16 = (x.astype(jnp.bfloat16).astype(jnp.float32)
                  @ gated.astype(jnp.bfloat16).astype(jnp.float32).T)
    # (b) loose check against the full-f32 reference (bf16 operand rounding)
    y_ref_f32 = x @ gated.T

    assert y.shape == (batch, output_features)
    assert jnp.allclose(y, y_ref_bf16, atol=1e-4, rtol=1e-4)
    assert jnp.allclose(y, y_ref_f32, atol=2e-2, rtol=2e-2)

    print("KERNEL_OK")
</pallas_src>

<mosaic_0001>
module attributes {stable_mosaic.version = 11 : i64} {
  func.func @_kakuritsu_linear_kernel(%arg0: i32, %arg1: i32, %arg2: i32, %arg3: memref<16x128xbf16, #tpu.memory_space<vmem>>, %arg4: memref<128x128xbf16, #tpu.memory_space<vmem>>, %arg5: memref<16x128xf32, #tpu.memory_space<vmem>>) attributes {dimension_semantics = [#tpu.dimension_semantics<parallel>, #tpu.dimension_semantics<parallel>, #tpu.dimension_semantics<arbitrary>], iteration_bounds = array<i64: 1, 1, 1>, scalar_prefetch = 0 : i64, scratch_operands = 0 : i64, tpu.core_type = #tpu.core_type<tc>, window_params = [{transform_indices = @transform_0, window_bounds = array<i64: 16, 128>}, {transform_indices = @transform_1, window_bounds = array<i64: 128, 128>}, {transform_indices = @transform_2, window_bounds = array<i64: 16, 128>}]} {
    %c0_i32 = arith.constant 0 : i32
    %0 = arith.cmpi eq, %arg2, %c0_i32 : i32
    %1 = arith.extui %0 : i1 to i32
    %c0_i32_0 = arith.constant 0 : i32
    %2 = arith.cmpi ne, %1, %c0_i32_0 : i32
    scf.if %2 {
      %cst_8 = arith.constant 0.000000e+00 : f32
      %9 = vector.broadcast %cst_8 : f32 to vector<16x128xf32>
      %c0_9 = arith.constant 0 : index
      %c0_10 = arith.constant 0 : index
      %10 = vector.load %arg5[%c0_9, %c0_10] : memref<16x128xf32, #tpu.memory_space<vmem>>, vector<16x128xf32>
      tpu.vector_store %arg5[%c0_9, %c0_10], %9 {strides = array<i32>} : memref<16x128xf32, #tpu.memory_space<vmem>>, vector<16x128xf32>,
    } else {
    }
    %c0 = arith.constant 0 : index
    %c0_1 = arith.constant 0 : index
    %3 = vector.load %arg5[%c0, %c0_1] : memref<16x128xf32, #tpu.memory_space<vmem>>, vector<16x128xf32>
    %c0_2 = arith.constant 0 : index
    %c0_3 = arith.constant 0 : index
    %4 = vector.load %arg3[%c0_2, %c0_3] : memref<16x128xbf16, #tpu.memory_space<vmem>>, vector<16x128xbf16>
    %c0_4 = arith.constant 0 : index
    %c0_5 = arith.constant 0 : index
    %5 = vector.load %arg4[%c0_4, %c0_5] : memref<128x128xbf16, #tpu.memory_space<vmem>>, vector<128x128xbf16>
    %cst = arith.constant dense<0.000000e+00> : vector<16x128xf32>
    %6 = tpu.matmul %4, %5, %cst {dimension_numbers = #tpu.dot_dimension_numbers<[1], [0], [0], [1], [0, 0, 1, 1], [], []>} : vector<16x128xbf16>, vector<128x128xbf16>, vector<16x128xf32> -> vector<16x128xf32>
    %7 = arith.addf %3, %6 : vector<16x128xf32>
    %c0_6 = arith.constant 0 : index
    %c0_7 = arith.constant 0 : index
    %8 = vector.load %arg5[%c0_6, %c0_7] : memref<16x128xf32, #tpu.memory_space<vmem>>, vector<16x128xf32>
    tpu.vector_store %arg5[%c0_6, %c0_7], %7 {strides = array<i32>} : memref<16x128xf32, #tpu.memory_space<vmem>>, vector<16x128xf32>,
    return
  }
  func.func @transform_0(%arg0: i32, %arg1: i32, %arg2: i32) -> (i32, i32) {
    %c0_i32 = arith.constant 0 : i32
    return %arg0, %arg2 : i32, i32
  }
  func.func @transform_1(%arg0: i32, %arg1: i32, %arg2: i32) -> (i32, i32) {
    %c0_i32 = arith.constant 0 : i32
    return %arg2, %arg1 : i32, i32
  }
  func.func @transform_2(%arg0: i32, %arg1: i32, %arg2: i32) -> (i32, i32) {
    %c0_i32 = arith.constant 0 : i32
    return %arg0, %arg1 : i32, i32
  }
}

</mosaic_0001>

<bundles_post_ra>
// kernel: kakuritsu_linear.1
= control target key start
LH: loop header
LB: loop body
LE: loop exit
PB: predicated region body
PF: predicated region fallthrough
CT: control target
= control target key end

     0   :  { %7 = vsyncpa [#allocation3], 0  ;;  %s230_s9 = smov [#allocation2]   ;;  %s262_s0 = inlined_call_operand.vmem [shape: bf16[16,128], index: 0, kind: input, shape index: {}]   ;;  %s263_s1 = inlined_call_operand.hbm [shape: bf16[128,128], index: 1, kind: input, shape index: {}]   ;;  %s264_s2 = inlined_call_operand.vmem [shape: f32[16,128], index: 2, kind: output, shape index: {}]  }
   0x1   :  { %s15_s10 = sshll.u32 %s230_s9, 4  ;;  %s16_s10 = int_to_ptr.vmem [resolvable:$true] %s15_s10 }
   0x2   :  { %s216_s11 = scalar_lea.vmem %s16_s10, 1024  ;;  %p221_p1 = scmp.lt.s32.totalorder %s16_s10, %s16_s10 }
   0x3   :  { %p217_p0 = scmp.ne.s32.totalorder %s16_s10, %s216_s11  ;;  %p222_p2 = scmp.lt.s32.totalorder %s216_s11, %s216_s11 }
   0x5   :  { %p223_p3 = por %p222_p2, %p221_p1 }
   0x7   :  { %p224_p4 = pnand %p223_p3, %p217_p0 }
   0x9   :  { %227 = shalt.err (!%p224_p4)
}
   0xa   :  { %s231_s12 = smov 64   ;;  %s232_s13 = smov 4  }
   0xb   :  { %21 = dma.hbm_to_vmem [thread:$0]  %s263_s1, 1024, %s16_s10, [#allocation3], %s231_s12, %s231_s12, %s232_s13  }
   0xc   :  { %228 = dma.done.wait [#allocation3], 1024  }
   0xd   :  { %229 = vsyncadd [#allocation3], 4294966272  ;;  %v233_v0 = vmov 0.0   ;;  %vm234_vm0 = vmmov 0   ;;  %v199_v1 = vld [vmem:[#allocation2 + $0x38] sm:$0xff]   ;;  %v200_v2 = vld [vmem:[#allocation2 + $0x30] sm:$0xff]  }
   0xe   :  { %174 = vmatprep.subr.bf16.mxu0 %v233_v0  ;;  %190 = vmatprep.mubr.msk.bf16.mxu0 %vm234_vm0, %v233_v0  ;;  %v201_v3 = vld [vmem:[#allocation2 + $0x28] sm:$0xff]   ;;  %v202_v4 = vld [vmem:[#allocation2 + $0x20] sm:$0xff]   ;;  %v203_v5 = vld [vmem:[#allocation2 + $0x18] sm:$0xff]  }
   0xf   :  { %175 = vmatpush3.bf16.msra.mxu0 %v199_v1  ;;  %v204_v6 = vld [vmem:[#allocation2 + $0x10] sm:$0xff]   ;;  %v205_v7 = vld [vmem:[#allocation2 + $0x8] sm:$0xff]   ;;  %v206_v8 = vld [vmem:[#allocation2] sm:$0xff]  }
  0x10   :  { %176 = vmatprep.subr.bf16.mxu0 %v233_v0  ;;  %v207_v9 = vld [vmem:[%s262_s0] sm:$0xff]  }
  0x13   :  { %177 = vmatpush3.bf16.msra.mxu0 %v200_v2 }
  0x14   :  { %178 = vmatprep.subr.bf16.mxu0 %v233_v0 }
  0x17   :  { %179 = vmatpush3.bf16.msra.mxu0 %v201_v3 }
  0x18   :  { %180 = vmatprep.subr.bf16.mxu0 %v233_v0 }
  0x1b   :  { %181 = vmatpush3.bf16.msra.mxu0 %v202_v4 }
  0x1c   :  { %182 = vmatprep.subr.bf16.mxu0 %v233_v0 }
  0x1f   :  { %183 = vmatpush3.bf16.msra.mxu0 %v203_v5 }
  0x20   :  { %184 = vmatprep.subr.bf16.mxu0 %v233_v0 }
  0x23   :  { %185 = vmatpush3.bf16.msra.mxu0 %v204_v6 }
  0x24   :  { %186 = vmatprep.subr.bf16.mxu0 %v233_v0 }
  0x27   :  { %187 = vmatpush3.bf16.msra.mxu0 %v205_v7 }
  0x28   :  { %188 = vmatprep.subr.bf16.mxu0 %v233_v0 }
  0x2b   :  { %189 = vmatpush3.bf16.msra.mxu0 %v206_v8 }
  0x2e   :  { %191 = vmatmul.mubr.bf16.vlgmr.msra.gmra.mxu0 %v207_v9 }
  0xee   :  { %v140_v10 = vpop.f32.mrf.mxu0 }
  0xef   :  { %149 = vst [vmem:[%s264_s2] sm:$0xff] %v140_v10 }
  0xf0   :  { %v192_v11 = vpop.f32.mrf.mxu0 }
  0xf2   :  { %v143_v12 = vpop.f32.mrf.mxu0 }
  0xf3   :  { %150 = vst [vmem:[%s264_s2 + $0x8] sm:$0xff] %v143_v12 }
  0xf4   :  { %v193_v13 = vpop.f32.mrf.mxu0 }
  0xf5   :  { %155 = vsyncpa [#allocation3], 1 }

</bundles_post_ra>
